<compile_context>
chip_gen: v6e
topology: v6e:2x2x1
jax: 0.10.0
libtpu: 0.0.40
codegen_flags: <defaults>
</compile_context>

<pallas_src>
import jax
import jax.numpy as jnp
from jax.experimental import pallas as pl
from jax.experimental.pallas import tpu as pltpu

LANE = 128          # lane width (last dim of every block)
MAX_TILE_ROWS = 4096  # 4096x128 f32 = 2 MiB block; ~8 MiB pipelined (fits v5e 16 MiB)


def simplenet_kernel(w1_ref, w2_ref, x_ref, o_ref):
    # w1_ref: SMEM (2,)  -> fc1 weights [W1[0,0], W1[1,0]]
    # w2_ref: SMEM (2,)  -> fc2 weights [W2[0,0], W2[0,1]]
    # x_ref:  VMEM (tile_rows, 128)  dense (sublane, lane) batch tile
    # o_ref:  VMEM (tile_rows, 128)
    x = x_ref[...]  # (tile_rows, 128) f32

    a = w1_ref[0]  # fc1 out-neuron 0 weight (scalar)
    b = w1_ref[1]  # fc1 out-neuron 1 weight (scalar)
    c = w2_ref[0]  # fc2 weight on hidden 0
    d = w2_ref[1]  # fc2 weight on hidden 1

    # fc1 + relu (per hidden unit), fused fc2 — pure VPU elementwise math.
    h0 = jnp.maximum(x * a, 0.0)
    h1 = jnp.maximum(x * b, 0.0)
    o_ref[...] = h0 * c + h1 * d


def simplenet_forward(x, w1, w2, *, max_tile_rows=MAX_TILE_ROWS):
    """x: (B, 1) float; w1: (2, 1); w2: (1, 2) (PyTorch (out_feat, in_feat) layout)."""
    B = x.shape[0]

    # Flatten weights to 1D for SMEM (avoids SMEM 2D padding to [8,128] words).
    w1f = w1.reshape(2).astype(jnp.float32)
    w2f = w2.reshape(2).astype(jnp.float32)

    # Dense (rows, 128) layout: batch fills both sublanes and lanes.
    rows = -(-B // LANE)  # ceil(B / 128)
    if rows <= max_tile_rows:
        # Small/medium batch: one block == whole array (block shape equal to
        # full array dims is exempt from the (8,128) divisibility rule), so
        # per-grid-step overhead is paid exactly once.
        tile_rows = rows
    else:
        # Large batch: MiB-scale row tiles (multiple of 8 -> (8,128) rule OK).
        tile_rows = max_tile_rows
        rows = -(-rows // tile_rows) * tile_rows

    padded = rows * LANE
    xt = x.reshape(B).astype(jnp.float32)
    if padded != B:
        # Zero padding is benign: relu(0*w) = 0, and the tail is sliced off.
        xt = jnp.pad(xt, (0, padded - B))
    xt = xt.reshape(rows, LANE)

    n_tiles = rows // tile_rows

    out = pl.pallas_call(
        simplenet_kernel,
        out_shape=jax.ShapeDtypeStruct((rows, LANE), jnp.float32),
        grid=(n_tiles,),
        in_specs=[
            pl.BlockSpec(memory_space=pltpu.MemorySpace.SMEM),     # w1 (2,)
            pl.BlockSpec(memory_space=pltpu.MemorySpace.SMEM),     # w2 (2,)
            pl.BlockSpec((tile_rows, LANE), lambda i: (i, 0)),     # x tile
        ],
        out_specs=pl.BlockSpec((tile_rows, LANE), lambda i: (i, 0)),
        compiler_params=pltpu.CompilerParams(
            # Row axis is independent -> "parallel" lets multi-TC chips (v7x)
            # shard the loop; harmless on single-TC v5e/v6e.
            dimension_semantics=("parallel",),
        ),
    )(w1f, w2f, xt)

    # Back to PyTorch-style (B, 1).
    return out.reshape(padded)[:B].reshape(B, 1).astype(x.dtype)


if __name__ == "__main__":
    key = jax.random.PRNGKey(0)
    kx, k1, k2 = jax.random.split(key, 3)

    # Batch of scalar inputs (B, 1), consistent with fc1 in_features=1.
    B = 256
    x = jax.random.normal(kx, (B, 1), dtype=jnp.float32)

    # Deterministic parameters in PyTorch shapes: (out_features, in_features).
    w1 = jax.random.uniform(k1, (2, 1), dtype=jnp.float32, minval=-1.0, maxval=1.0)
    w2 = jax.random.uniform(k2, (1, 2), dtype=jnp.float32, minval=-1.0, maxval=1.0)

    out = simplenet_forward(x, w1, w2)
    out = jax.block_until_ready(out)

    # Sanity check against plain-JAX reference of the PyTorch forward.
    ref = jnp.maximum(x @ w1.T, 0.0) @ w2.T
    assert out.shape == (B, 1)
    assert jnp.allclose(out, ref, atol=1e-5, rtol=1e-5)

    print("KERNEL_OK")
</pallas_src>

<mosaic_0001>
module attributes {stable_mosaic.version = 11 : i64} {
  func.func @simplenet_kernel(%arg0: i32, %arg1: memref<2xf32, #tpu.memory_space<smem>>, %arg2: memref<2xf32, #tpu.memory_space<smem>>, %arg3: memref<2x128xf32, #tpu.memory_space<vmem>>, %arg4: memref<2x128xf32, #tpu.memory_space<vmem>>) attributes {dimension_semantics = [#tpu.dimension_semantics<parallel>], iteration_bounds = array<i64: 1>, scalar_prefetch = 0 : i64, scratch_operands = 0 : i64, tpu.core_type = #tpu.core_type<tc>, window_params = [{transform_indices = @transform_0, window_bounds = array<i64: 2>}, {transform_indices = @transform_1, window_bounds = array<i64: 2>}, {transform_indices = @transform_2, window_bounds = array<i64: 2, 128>}, {transform_indices = @transform_3, window_bounds = array<i64: 2, 128>}]} {
    %c0 = arith.constant 0 : index
    %c0_0 = arith.constant 0 : index
    %0 = vector.load %arg3[%c0, %c0_0] : memref<2x128xf32, #tpu.memory_space<vmem>>, vector<2x128xf32>
    %c0_1 = arith.constant 0 : index
    %1 = memref.load %arg1[%c0_1] : memref<2xf32, #tpu.memory_space<smem>>
    %c1 = arith.constant 1 : index
    %2 = memref.load %arg1[%c1] : memref<2xf32, #tpu.memory_space<smem>>
    %c0_2 = arith.constant 0 : index
    %3 = memref.load %arg2[%c0_2] : memref<2xf32, #tpu.memory_space<smem>>
    %c1_3 = arith.constant 1 : index
    %4 = memref.load %arg2[%c1_3] : memref<2xf32, #tpu.memory_space<smem>>
    %5 = vector.broadcast %1 : f32 to vector<2x128xf32>
    %6 = arith.mulf %0, %5 : vector<2x128xf32>
    %cst = arith.constant 0.000000e+00 : f32
    %7 = vector.broadcast %cst : f32 to vector<2x128xf32>
    %8 = arith.maximumf %6, %7 : vector<2x128xf32>
    %9 = vector.broadcast %2 : f32 to vector<2x128xf32>
    %10 = arith.mulf %0, %9 : vector<2x128xf32>
    %cst_4 = arith.constant 0.000000e+00 : f32
    %11 = vector.broadcast %cst_4 : f32 to vector<2x128xf32>
    %12 = arith.maximumf %10, %11 : vector<2x128xf32>
    %13 = vector.broadcast %3 : f32 to vector<2x128xf32>
    %14 = arith.mulf %8, %13 : vector<2x128xf32>
    %15 = vector.broadcast %4 : f32 to vector<2x128xf32>
    %16 = arith.mulf %12, %15 : vector<2x128xf32>
    %17 = arith.addf %14, %16 : vector<2x128xf32>
    %c0_5 = arith.constant 0 : index
    %c0_6 = arith.constant 0 : index
    %18 = vector.load %arg4[%c0_5, %c0_6] : memref<2x128xf32, #tpu.memory_space<vmem>>, vector<2x128xf32>
    tpu.vector_store %arg4[%c0_5, %c0_6], %17 {strides = array<i32>} : memref<2x128xf32, #tpu.memory_space<vmem>>, vector<2x128xf32>,
    return
  }
  func.func @transform_0(%arg0: i32) -> i32 {
    %c0_i32 = arith.constant 0 : i32
    %c0_i32_0 = arith.constant 0 : i32
    return %c0_i32 : i32
  }
  func.func @transform_1(%arg0: i32) -> i32 {
    %c0_i32 = arith.constant 0 : i32
    %c0_i32_0 = arith.constant 0 : i32
    return %c0_i32 : i32
  }
  func.func @transform_2(%arg0: i32) -> (i32, i32) {
    %c0_i32 = arith.constant 0 : i32
    %c0_i32_0 = arith.constant 0 : i32
    return %arg0, %c0_i32 : i32, i32
  }
  func.func @transform_3(%arg0: i32) -> (i32, i32) {
    %c0_i32 = arith.constant 0 : i32
    %c0_i32_0 = arith.constant 0 : i32
    return %arg0, %c0_i32 : i32, i32
  }
}

</mosaic_0001>

<bundles_post_ra>
// kernel: tpu_custom_call.1
= control target key start
LH: loop header
LB: loop body
LE: loop exit
PB: predicated region body
PF: predicated region fallthrough
CT: control target
= control target key end

     0   :  { %8 = vsyncpa [#allocation4], 0  ;;  %s157_s0 = inlined_call_operand.hbm [shape: f32[2], index: 0, kind: input, shape index: {}]   ;;  %s158_s1 = inlined_call_operand.vmem [shape: f32[2], index: 1, kind: input, shape index: {}]   ;;  %s159_s2 = inlined_call_operand.vmem [shape: f32[2,128], index: 2, kind: input, shape index: {}]   ;;  %s160_s3 = inlined_call_operand.hbm [shape: f32[2,128], index: 3, kind: output, shape index: {}]  }
   0x1   :  { %9 = vsyncpa [#allocation5], 0 }
   0x2   :  { %10 = vsyncpa [#allocation3], 0  ;;  %s25_s14 = sshll.u32 %s158_s1, 4  ;;  %s122_s15 = smov [#allocation2]   ;;  %s26_s14 = int_to_ptr.vmem [resolvable:$true] %s25_s14 }
   0x3   :  { %18 = dma.hbm_to_smem %s157_s0, 16, %s122_s15, [#allocation4]  }
   0x4   :  { %s84_s18 = scalar_lea.vmem %s26_s14, 16  ;;  %p89_p1 = scmp.lt.s32.totalorder %s26_s14, %s26_s14 }
   0x5   :  { %p85_p0 = scmp.ne.s32.totalorder %s26_s14, %s84_s18  ;;  %p90_p2 = scmp.lt.s32.totalorder %s84_s18, %s84_s18 }
   0x7   :  { %p91_p3 = por %p90_p2, %p89_p1 }
   0x9   :  { %p92_p4 = pnand %p91_p3, %p85_p0 }
   0xb   :  { %95 = shalt.err (!%p92_p4)
}
   0xc   :  { %s123_s19 = smov [#allocation6]  }
   0xd   :  { %28 = dma.vmem_to_smem %s26_s14, 16, %s123_s19, [#allocation5]  }
   0xe   :  { %116 = dma.done.wait [#allocation4], 16  }
   0xf   :  { %117 = vsyncadd [#allocation4], 4294967280 }
  0x10   :  { %118 = dma.done.wait [#allocation5], 16  }
  0x11   :  { %119 = vsyncadd [#allocation5], 4294967280 }
  0x12   :  { %37 = sfence }
  0x13   :  { %s39_s1 = sld [smem:[#allocation2]]  ;;  %v38_v0 = vld [vmem:[%s159_s2] sm:$0x3]  ;;  %s124_s24 = smov [#allocation7]  }
  0x14   :  { %s71_s20 = sld [smem:[#allocation2 + $0x1]]  ;;  %s61_s25 = sshll.u32 %s124_s24, 4  ;;  %s62_s25 = int_to_ptr.vmem [resolvable:$true] %s61_s25 }
  0x15   :  { %s41_s21 = sld [smem:[#allocation6]]  ;;  %s96_s26 = scalar_lea.vmem %s62_s25, 32 }
  0x16   :  { %s72_s22 = sld [smem:[#allocation6 + $0x1]]  ;;  %p97_p5 = scmp.ne.s32.totalorder %s62_s25, %s96_s26 }
  0x17   :  { %p101_p6 = scmp.lt.s32.totalorder %s62_s25, %s62_s25  ;;  %p102_p7 = scmp.lt.s32.totalorder %s96_s26, %s96_s26 }
  0x19   :  { %v43_v1 = vstv %s39_s1  ;;  %p103_p8 = por %p102_p7, %p101_p6 }
  0x1a   :  { %v44_v2 = vmul.f32 %v43_v1, %v38_v0  ;;  %v46_v3 = vstv %s71_s20 }
  0x1b   :  { %v47_v4 = vmul.f32 %v46_v3, %v38_v0  ;;  %v49_v5 = vstv %s41_s21  ;;  %p104_p9 = pnand %p103_p8, %p97_p5 }
  0x1c   :  { %v45_v6 = vmax.f32 %v44_v2, 0.0  ;;  %v51_v7 = vstv %s72_s22 }
  0x1d   :  { %v48_v8 = vmax.f32 %v47_v4, 0.0 }
  0x1e   :  { %v50_v9 = vmul.f32 %v49_v5, %v45_v6 }
  0x1f   :  { %v52_v10 = vmul.f32 %v51_v7, %v48_v8 }
  0x21   :  { %v53_v11 = vadd.f32 %v52_v10, %v50_v9 }
  0x23   :  { %54 = vst [vmem:[#allocation7] sm:$0x3] %v53_v11 }
  0x24   :  { %107 = shalt.err (!%p104_p9)
}
  0x25   :  { %64 = dma.vmem_to_hbm [thread:$0]  %s62_s25, 32, %s160_s3, [#allocation3]  }
  0x26   :  { %120 = dma.done.wait [#allocation3], 32  }
  0x27   :  { %121 = vsyncadd [#allocation3], 4294967264 }
  0x28   :  { %68 = vsyncpa [#allocation3], 1 }
  0x29   :  { %69 = vsyncpa [#allocation4], 1 }
  0x2a   :  { %70 = vsyncpa [#allocation5], 1 }

</bundles_post_ra>
